<compile_context>
chip_gen: v5e
topology: v5e:2x2
jax: 0.10.0
libtpu: 0.0.40
codegen_flags: <defaults>
</compile_context>

<pallas_src>
import jax
import jax.numpy as jnp
from jax.experimental import pallas as pl
from jax.experimental.pallas import tpu as pltpu


def resblock_kernel(alpha_ref, x_ref, w1_ref, b1_ref, w2_ref, b2_ref, o_ref):
    """Whole pre-activation residual block for one batch tile.

    alpha_ref: (1, 1)  f32 in SMEM      -- PReLU slope
    x_ref:     (TB, H) in VMEM          -- current batch tile
    w1_ref:    (H, H)  in VMEM, (in,out) layout; resident across grid steps
    b1_ref:    (1, H)  f32 in VMEM
    w2_ref:    (H, H)  in VMEM, (in,out) layout
    b2_ref:    (1, H)  f32 in VMEM
    o_ref:     (TB, H) in VMEM
    """
    a = alpha_ref[0, 0]
    xf = x_ref[...].astype(jnp.float32)

    # x = l1(act(x))  -- PReLU in f32, matmul operands in the resident weight dtype.
    h1 = jnp.where(xf > 0, xf, a * xf).astype(w1_ref.dtype)
    y1 = jnp.dot(h1, w1_ref[...], preferred_element_type=jnp.float32) + b1_ref[...]

    # x = l2(act(x))
    h2 = jnp.where(y1 > 0, y1, a * y1).astype(w2_ref.dtype)
    y2 = jnp.dot(h2, w2_ref[...], preferred_element_type=jnp.float32) + b2_ref[...]

    # residual
    o_ref[...] = (y2 + xf).astype(o_ref.dtype)


def _choose_batch_tile(B, tile_b, sub):
    """Pick (tb, padded_B).

    Prefer a sublane-aligned tile that divides B exactly (no jnp.pad copy) and
    yields a grid of >= 2 steps (so both v7x TensorCores get work). Fall back to
    a full-array block or padding only for ragged batch sizes.
    """
    if B % sub != 0:
        if B <= tile_b:
            return B, B                       # full-array block is always legal
        tb = max(sub, (tile_b // sub) * sub)
        return tb, int(pl.cdiv(B, tb)) * tb   # last resort: pad
    # Largest sub-aligned divisor of B that is <= tile_b.
    tb = min((tile_b // sub) * sub, B)
    while tb > sub and B % tb != 0:
        tb -= sub
    if B % tb != 0:
        tb = sub
    # Keep the grid >= 2 steps when the batch allows it (megacore on v7x).
    if B // tb < 2 and B >= 2 * sub:
        tb = max(sub, (B // 2 // sub) * sub)
        while B % tb != 0:
            tb -= sub
    return tb, B


def two_layer_preact_resnet_linear(x, w1, b1, w2, b2, alpha, *,
                                   tile_b=2048, matmul_dtype=None):
    """x: (B, H). w1, w2: (H, H) in PyTorch layout (out, in). b1, b2: (H,).

    matmul_dtype: dtype used for the MXU operands (weights and pre-activations).
    Defaults to x.dtype. Pass jnp.bfloat16 on v6e/v7x for ~2x matmul / weight-DMA
    savings (validate numerics for your use case).
    """
    B, H = x.shape
    if matmul_dtype is None:
        matmul_dtype = x.dtype

    # One-time weight transpose to canonical (in, out) layout for x @ W.
    w1_t = jnp.asarray(w1).T.astype(matmul_dtype)
    w2_t = jnp.asarray(w2).T.astype(matmul_dtype)
    b1_2d = jnp.asarray(b1).reshape(1, H).astype(jnp.float32)
    b2_2d = jnp.asarray(b2).reshape(1, H).astype(jnp.float32)
    alpha_2d = jnp.asarray(alpha, jnp.float32).reshape(1, 1)

    sub = 16 if x.dtype == jnp.bfloat16 else 8
    tb, b_pad = _choose_batch_tile(B, tile_b, sub)
    x_in = x if b_pad == B else jnp.pad(x, ((0, b_pad - B), (0, 0)))
    grid = (b_pad // tb,)

    io_bytes = jnp.dtype(x.dtype).itemsize
    w_bytes = jnp.dtype(matmul_dtype).itemsize

    # VMEM budget: double-buffered resident weights/biases, double-buffered x/out
    # tiles, plus the live f32 intermediates inside the kernel body, plus slack.
    vmem_need = int(
        2 * (2 * H * H * w_bytes)        # w1, w2 (x2 pipeline buffers)
        + 2 * (2 * H * 4)                # b1, b2
        + 2 * 2 * tb * H * io_bytes      # x tile + out tile, double-buffered
        + 6 * tb * H * 4                 # xf, h1, y1, h2, y2, residual (f32 live)
        + (2 << 20)
    )
    try:
        phys_vmem = int(pltpu.get_tpu_info().vmem_capacity_bytes)
    except Exception:
        phys_vmem = 64 << 20             # conservative (v7x per-TC)
    vmem_ceiling = max(16 << 20, min(phys_vmem - (16 << 20), 48 << 20))
    vmem_limit = int(min(max(vmem_need, 4 << 20), vmem_ceiling))

    cost = pl.CostEstimate(
        flops=4 * b_pad * H * H,         # two (b_pad,H)x(H,H) matmuls
        transcendentals=0,
        bytes_accessed=int(2 * b_pad * H * io_bytes + 2 * H * H * w_bytes + 2 * H * 4),
    )

    out = pl.pallas_call(
        resblock_kernel,
        out_shape=jax.ShapeDtypeStruct((b_pad, H), x.dtype),
        grid=grid,
        in_specs=[
            # PReLU slope -> SMEM scalar, same block every step.
            pl.BlockSpec((1, 1), lambda i: (0, 0),
                         memory_space=pltpu.MemorySpace.SMEM),
            # Activation tile marches over the batch.
            pl.BlockSpec((tb, H), lambda i: (i, 0)),
            # Weights / biases: constant index map -> VMEM resident across grid steps.
            pl.BlockSpec((H, H), lambda i: (0, 0)),
            pl.BlockSpec((1, H), lambda i: (0, 0)),
            pl.BlockSpec((H, H), lambda i: (0, 0)),
            pl.BlockSpec((1, H), lambda i: (0, 0)),
        ],
        out_specs=pl.BlockSpec((tb, H), lambda i: (i, 0)),
        compiler_params=pltpu.CompilerParams(
            dimension_semantics=("parallel",),   # megacore sharding on v7x
            vmem_limit_bytes=vmem_limit,
        ),
        cost_estimate=cost,
    )(alpha_2d, x_in, w1_t, b1_2d, w2_t, b2_2d)

    return out[:B] if b_pad != B else out


def _init_linear(key, fan_in, fan_out):
    """Deterministic init mimicking torch.nn.Linear default (uniform +-1/sqrt(fan_in))."""
    kw, kb = jax.random.split(key)
    bound = 1.0 / jnp.sqrt(fan_in)
    w = jax.random.uniform(kw, (fan_out, fan_in), jnp.float32, -bound, bound)
    b = jax.random.uniform(kb, (fan_out,), jnp.float32, -bound, bound)
    return w, b


def reference_forward(x, w1, b1, w2, b2, alpha):
    """Pure-JAX reference of the PyTorch forward (eval mode)."""
    def prelu(v):
        return jnp.where(v > 0, v, alpha * v)
    x_input = x
    h = prelu(x) @ w1.T + b1
    h = prelu(h) @ w2.T + b2
    return h + x_input


if __name__ == "__main__":
    # Lane-aligned test shape: B=512 rows, hidden_dim H=128.
    # Tile selection splits this into 2 grid steps of 256 rows (exercises the
    # pipelined / megacore path) with no padding.
    B, H = 512, 128

    key = jax.random.PRNGKey(0)
    kx, k1, k2 = jax.random.split(key, 3)

    x = jax.random.normal(kx, (B, H), jnp.float32)
    w1, b1 = _init_linear(k1, H, H)
    w2, b2 = _init_linear(k2, H, H)
    alpha = 0.25  # PReLU default init

    out = two_layer_preact_resnet_linear(x, w1, b1, w2, b2, alpha)
    out = jax.block_until_ready(out)

    ref = reference_forward(x, w1, b1, w2, b2, alpha)
    assert out.shape == (B, H)
    assert jnp.allclose(out, ref, atol=1e-4, rtol=1e-4), "mismatch vs reference"

    print("KERNEL_OK")
</pallas_src>

<mosaic_0001>
module attributes {stable_mosaic.version = 11 : i64} {
  func.func @resblock_kernel(%arg0: i32, %arg1: memref<1x1xf32, #tpu.memory_space<smem>>, %arg2: memref<256x128xf32, #tpu.memory_space<vmem>>, %arg3: memref<128x128xf32, #tpu.memory_space<vmem>>, %arg4: memref<1x128xf32, #tpu.memory_space<vmem>>, %arg5: memref<128x128xf32, #tpu.memory_space<vmem>>, %arg6: memref<1x128xf32, #tpu.memory_space<vmem>>, %arg7: memref<256x128xf32, #tpu.memory_space<vmem>>) attributes {dimension_semantics = [#tpu.dimension_semantics<parallel>], iteration_bounds = array<i64: 2>, scalar_prefetch = 0 : i64, scratch_operands = 0 : i64, tpu.core_type = #tpu.core_type<tc>, window_params = [{transform_indices = @transform_0, window_bounds = array<i64: 1, 1>}, {transform_indices = @transform_1, window_bounds = array<i64: 256, 128>}, {pipeline_mode = #tpu.pipeline_mode<synchronous>, transform_indices = @transform_2, window_bounds = array<i64: 128, 128>}, {pipeline_mode = #tpu.pipeline_mode<synchronous>, transform_indices = @transform_3, window_bounds = array<i64: 1, 128>}, {pipeline_mode = #tpu.pipeline_mode<synchronous>, transform_indices = @transform_4, window_bounds = array<i64: 128, 128>}, {pipeline_mode = #tpu.pipeline_mode<synchronous>, transform_indices = @transform_5, window_bounds = array<i64: 1, 128>}, {transform_indices = @transform_6, window_bounds = array<i64: 256, 128>}]} {
    %c0 = arith.constant 0 : index
    %c0_0 = arith.constant 0 : index
    %0 = memref.load %arg1[%c0, %c0_0] : memref<1x1xf32, #tpu.memory_space<smem>>
    %c0_1 = arith.constant 0 : index
    %c0_2 = arith.constant 0 : index
    %1 = vector.load %arg2[%c0_1, %c0_2] : memref<256x128xf32, #tpu.memory_space<vmem>>, vector<256x128xf32>
    %cst = arith.constant 0.000000e+00 : f32
    %2 = vector.broadcast %cst : f32 to vector<256x128xf32>
    %3 = arith.cmpf ogt, %1, %2 : vector<256x128xf32>
    %4 = vector.broadcast %0 : f32 to vector<256x128xf32>
    %5 = arith.mulf %4, %1 : vector<256x128xf32>
    %6 = arith.select %3, %1, %5 : vector<256x128xi1>, vector<256x128xf32>
    %c0_3 = arith.constant 0 : index
    %c0_4 = arith.constant 0 : index
    %7 = vector.load %arg3[%c0_3, %c0_4] : memref<128x128xf32, #tpu.memory_space<vmem>>, vector<128x128xf32>
    %cst_5 = arith.constant dense<0.000000e+00> : vector<256x128xf32>
    %8 = tpu.matmul %6, %7, %cst_5 {dimension_numbers = #tpu.dot_dimension_numbers<[1], [0], [0], [1], [0, 0, 1, 1], [], []>} : vector<256x128xf32>, vector<128x128xf32>, vector<256x128xf32> -> vector<256x128xf32>
    %c0_6 = arith.constant 0 : index
    %c0_7 = arith.constant 0 : index
    %9 = vector.load %arg4[%c0_6, %c0_7] : memref<1x128xf32, #tpu.memory_space<vmem>>, vector<1x128xf32>
    %10 = vector.broadcast %9 : vector<1x128xf32> to vector<256x128xf32>
    %11 = arith.addf %8, %10 : vector<256x128xf32>
    %cst_8 = arith.constant 0.000000e+00 : f32
    %12 = vector.broadcast %cst_8 : f32 to vector<256x128xf32>
    %13 = arith.cmpf ogt, %11, %12 : vector<256x128xf32>
    %14 = vector.broadcast %0 : f32 to vector<256x128xf32>
    %15 = arith.mulf %14, %11 : vector<256x128xf32>
    %16 = arith.select %13, %11, %15 : vector<256x128xi1>, vector<256x128xf32>
    %c0_9 = arith.constant 0 : index
    %c0_10 = arith.constant 0 : index
    %17 = vector.load %arg5[%c0_9, %c0_10] : memref<128x128xf32, #tpu.memory_space<vmem>>, vector<128x128xf32>
    %cst_11 = arith.constant dense<0.000000e+00> : vector<256x128xf32>
    %18 = tpu.matmul %16, %17, %cst_11 {dimension_numbers = #tpu.dot_dimension_numbers<[1], [0], [0], [1], [0, 0, 1, 1], [], []>} : vector<256x128xf32>, vector<128x128xf32>, vector<256x128xf32> -> vector<256x128xf32>
    %c0_12 = arith.constant 0 : index
    %c0_13 = arith.constant 0 : index
    %19 = vector.load %arg6[%c0_12, %c0_13] : memref<1x128xf32, #tpu.memory_space<vmem>>, vector<1x128xf32>
    %20 = vector.broadcast %19 : vector<1x128xf32> to vector<256x128xf32>
    %21 = arith.addf %18, %20 : vector<256x128xf32>
    %22 = arith.addf %21, %1 : vector<256x128xf32>
    %c0_14 = arith.constant 0 : index
    %c0_15 = arith.constant 0 : index
    %23 = vector.load %arg7[%c0_14, %c0_15] : memref<256x128xf32, #tpu.memory_space<vmem>>, vector<256x128xf32>
    tpu.vector_store %arg7[%c0_14, %c0_15], %22 {strides = array<i32>} : memref<256x128xf32, #tpu.memory_space<vmem>>, vector<256x128xf32>,
    return
  }
  func.func @transform_0(%arg0: i32) -> (i32, i32) {
    %c0_i32 = arith.constant 0 : i32
    %c0_i32_0 = arith.constant 0 : i32
    %c0_i32_1 = arith.constant 0 : i32
    return %c0_i32, %c0_i32_0 : i32, i32
  }
  func.func @transform_1(%arg0: i32) -> (i32, i32) {
    %c0_i32 = arith.constant 0 : i32
    %c0_i32_0 = arith.constant 0 : i32
    return %arg0, %c0_i32 : i32, i32
  }
  func.func @transform_2(%arg0: i32) -> (i32, i32) {
    %c0_i32 = arith.constant 0 : i32
    %c0_i32_0 = arith.constant 0 : i32
    %c0_i32_1 = arith.constant 0 : i32
    return %c0_i32, %c0_i32_0 : i32, i32
  }
  func.func @transform_3(%arg0: i32) -> (i32, i32) {
    %c0_i32 = arith.constant 0 : i32
    %c0_i32_0 = arith.constant 0 : i32
    %c0_i32_1 = arith.constant 0 : i32
    return %c0_i32, %c0_i32_0 : i32, i32
  }
  func.func @transform_4(%arg0: i32) -> (i32, i32) {
    %c0_i32 = arith.constant 0 : i32
    %c0_i32_0 = arith.constant 0 : i32
    %c0_i32_1 = arith.constant 0 : i32
    return %c0_i32, %c0_i32_0 : i32, i32
  }
  func.func @transform_5(%arg0: i32) -> (i32, i32) {
    %c0_i32 = arith.constant 0 : i32
    %c0_i32_0 = arith.constant 0 : i32
    %c0_i32_1 = arith.constant 0 : i32
    return %c0_i32, %c0_i32_0 : i32, i32
  }
  func.func @transform_6(%arg0: i32) -> (i32, i32) {
    %c0_i32 = arith.constant 0 : i32
    %c0_i32_0 = arith.constant 0 : i32
    return %arg0, %c0_i32 : i32, i32
  }
}

</mosaic_0001>

<bundles_post_ra>
// kernel: tpu_custom_call.1
= control target key start
LH: loop header
LB: loop body
LE: loop exit
PB: predicated region body
PF: predicated region fallthrough
CT: control target
= control target key end

     0   :  { %s1858_s0 = inlined_call_operand.<no memory space> [shape: f32[1,1], index: 0, kind: input, shape index: {}]   ;;  %s1859_s1 = inlined_call_operand.hbm [shape: f32[512,128], index: 1, kind: input, shape index: {}]   ;;  %s1860_s2 = inlined_call_operand.hbm [shape: f32[128,128], index: 2, kind: input, shape index: {}]   ;;  %s1861_s3 = inlined_call_operand.vmem [shape: f32[1,128], index: 3, kind: input, shape index: {}]   ;;  %s1862_s4 = inlined_call_operand.hbm [shape: f32[128,128], index: 4, kind: input, shape index: {}]   ;;  %s1863_s5 = inlined_call_operand.vmem [shape: f32[1,128], index: 5, kind: input, shape index: {}]   ;;  %s1864_s6 = inlined_call_operand.hbm [shape: f32[512,128], index: 6, kind: output, shape index: {}]  }
   0x1   :  { %11 = sst [smem:[#allocation2]] %s1858_s0 }
   0x2   :  { %12 = vsyncpa [#allocation4], 0 }
   0x3   :  { %14 = vsyncpa [#allocation4 + $0x1], 0 }
   0x4   :  { %15 = vsyncpa [#allocation7], 0 }
   0x5   :  { %16 = vsyncpa [#allocation5], 0 }
   0x6   :  { %18 = vsyncpa [#allocation5 + $0x1], 0  ;;  %s1303_s23 = smov 0   ;;  %s1305_s24 = smov 0  }
   0x7   :  { %s1307_s25 = smov 0   ;;  %s1309_s26 = smov 0  }
   0x8 LB: > { %s1324_s0 = sadd.s32 4294967295, %s1257_s26   ;;  %s972_s27 = sadd.s32 4294967294, %s1257_s26   ;;  %s1257_s26 = sphi %s1309_s26, %s1876_s26   ;;  %s1253_s25 = sphi %s1307_s25, %s1875_s25   ;;  %s1249_s24 = sphi %s1305_s24, %s1874_s24   ;;  %s1245_s23 = sphi %s1303_s23, %s1873_s23  }
   0x9   : > { %p65_p0 = scmp.ne.s32.totalorder %s1249_s24, %s1245_s23  ;;  %p66_p1 = scmp.eq.s32.totalorder %s1324_s0, 0 }
   0xa   : > { %p173_p2 = scmp.eq.s32.totalorder %s1324_s0, 1  ;;  %p179_p3 = scmp.eq.s32.totalorder %s972_s27, 1 }
   0xb   : > { %p1333_p4 = por %p66_p1, %p65_p0  ;;  %p973_p5 = scmp.ge.s32.totalorder %s1257_s26, 1 }
   0xc   : > { %p1338_p6 = por %p179_p3, %p65_p0  ;;  %p186_p7 = scmp.lt.s32.totalorder %s1257_s26, 3 }
   0xd   : > { %s200_s8 = sshll.u32 %s1860_s2, 4  ;;  %s1259_s10 = smov [#allocation6]   ;;  %s201_s8 = int_to_ptr.hbm [resolvable:$true] %s200_s8 }
   0xe   : > { %p1346_p8 = pnand %p973_p5, %p186_p7  ;;  %s202_s11 = sshll.u32 %s1259_s10, 4  ;;  %s203_s11 = int_to_ptr.vmem [resolvable:$true] %s202_s11 }
   0xf   : > { %s217_s14 = sshll.u32 %s1862_s4, 4  ;;  %s1865_s15 = smov 128   ;;  %s218_s14 = int_to_ptr.hbm [resolvable:$true] %s217_s14 }
  0x10   : > { %p1036_p9 = pneg %p1346_p8  ;;  %s1261_s16 = smov 8  }
  0x11   : > { %s1262_s17 = smov [#allocation8]   ;;  %s1365_s19 = sadd.s32 1, %s1257_s26  }
  0x12   : > { %p1037_p10 = pnand %p1036_p9, %p66_p1  ;;  %s219_s18 = sshll.u32 %s1262_s17, 4  ;;  %s220_s18 = int_to_ptr.vmem [resolvable:$true] %s219_s18 }
  0x13   : > { %s52_s20 = sadd.s32 1, %s1253_s25  ;;  %s49_s21 = ssub.s32 %s1257_s26, %s1365_s19 }
  0x14   : > { %1039 = dma.hbm_to_vmem [thread:$0]  (!%p1037_p10), %s201_s8, 2048, %s203_s11, [#allocation7], %s1865_s15, %s1865_s15, %s1261_s16  }
  0x15   : > { %1042 = dma.hbm_to_vmem [thread:$0]  (!%p1037_p10), %s218_s14, 2048, %s220_s18, [#allocation7], %s1865_s15, %s1865_s15, %s1261_s16  }
  0x16   : > { %p59_p12 = scmp.ne.s32.totalorder %s1253_s25, %s1249_s24  ;;  %p50_p13 = scmp.eq.s32.totalorder %s49_s21, 0 }
  0x17   : > { %p60_p0 = scmp.eq.s32.totalorder %s1257_s26, 0  ;;  %p1053_p5 = scmp.lt.s32.totalorder %s1257_s26, 2 }
  0x18   : > { %p1375_p3 = por %p173_p2, %p59_p12  ;;  %s236_s30 = sand.u32 1, %s1253_s25  }
  0x19   : > { %s1381_s27 = scalar_select %p50_p13, %s1253_s25, %s52_s20  }
  0x1a   : > { %p61_p7 = por %p60_p0, %p59_p12  ;;  %s977_s7 = sshll.u32 %s236_s30, 8 }
  0x1b   : > { %s990_s8 = sshll.u32 %s1257_s26, 8  ;;  %s240_s13 = scalar_lea.vmem [#allocation3], %s977_s7 }
  0x1c   : > { %s245_s12 = scalar_lea.hbm %s1859_s1, %s990_s8  ;;  %s248_s14 = sshll.u32 %s240_s13, 4  ;;  %s249_s14 = int_to_ptr.vmem [resolvable:$true] %s248_s14 }
  0x1d   : > { %s246_s17 = sshll.u32 %s245_s12, 4  ;;  %p1388_p2 = pnand %p1053_p5, %p61_p7  ;;  %s247_s17 = int_to_ptr.hbm [resolvable:$true] %s246_s17 }
  0x1e   : > { %s237_s20 = scalar_lea.sflag [#allocation4], %s236_s30  ;;  %s1157_s21 = sshra.s32 %s247_s17, 4  ;;  %s1158_s21 = int_to_ptr.hbm [resolvable:$true] %s1157_s21 }
  0x1f   : > { %s1159_s15 = scalar_lea.hbm %s1158_s21, 256  ;;  %p1161_p10 = pneg %p1388_p2 }
  0x20   : > { %p1160_p9 = scmp.ne.s32.totalorder %s1158_s21, %s1159_s15  ;;  %s1164_s10 = scalar_lea.hbm %s1859_s1, 512 }
  0x21   : > { %p1165_p0 = scmp.lt.s32.totalorder %s1158_s21, %s1859_s1  ;;  %p1166_p5 = scmp.lt.s32.totalorder %s1164_s10, %s1159_s15 }
  0x22   : > { %p1162_p12 = pnand %p1161_p10, %p1160_p9 }
  0x23   : > { %p1167_p7 = por %p1166_p5, %p1165_p0 }
  0x24   : > { %p1163_p13 = pneg %p1162_p12 }
  0x26   : > { %p1168_p11 = pnand %p1167_p7, %p1163_p13 }
  0x28   : > { %1171 = shalt.err (!%p1168_p11)
}
  0x29   : > { %s1871_s30 = smov 128   ;;  %260 = sbr.rel (%p1346_p8) target bundleno = 478 (0x1de), region = 44 }
  0x2a   : > { %1046 = dma.hbm_to_vmem [thread:$0]  (!%p1388_p2), %s247_s17, 4096, %s249_s14, %s237_s20, %s1871_s30, %s1871_s30, %s1261_s16  }
  0x2b   : > { %s1408_s13 = sand.u32 (!%p1346_p8), 1, %s1249_s24  }
  0x2c   : > { %s981_s15 = sshll.u32 (!%p1346_p8), %s1408_s13, 8  ;;  %s263_s21 = scalar_lea.sflag (!%p1346_p8), [#allocation4], %s1408_s13 }
  0x2d   : > { %s1414_s8 = scalar_lea.vmem (!%p1346_p8), [#allocation3], %s981_s15 }
  0x2e   : > { %1232 = dma.done.wait (%p1333_p4), %s263_s21, 4096  }
  0x2f   : > { %1234 = vsyncadd (%p1333_p4), %s263_s21, 4294963200 }
  0x30   : > { %1236 = dma.done.wait (%p66_p1), [#allocation7], 4096  }
  0x31   : > { %1238 = vsyncadd (%p66_p1), [#allocation7], 4294963200  ;;  %v453_v0 = vld [vmem:[#allocation6 + $0x78] sm:$0xff]  ;;  %v452_v1 = vld [vmem:[#allocation6 + $0x70] sm:$0xff]  ;;  %s308_s28 = sld [smem:[#allocation2]]  ;;  %s1728_s18 = scalar_lea.vmem [#allocation9], %s981_s15 }
  0x32   : > { %992 = vmatpush.msra.mxu2 %v453_v0  ;;  %458 = vmatpush.msra.mxu0 %v453_v0  ;;  %v451_v2 = vld [vmem:[#allocation6 + $0x68] sm:$0xff]  ;;  %v450_v3 = vld [vmem:[#allocation6 + $0x60] sm:$0xff]  ;;  %v449_v4 = vld [vmem:[#allocation6 + $0x58] sm:$0xff]  ;;  %s991_s20 = sshll.u32 %s1324_s0, 8  ;;  %s877_s12 = sshll.u32 %s1728_s18, 4  ;;  %s878_s12 = int_to_ptr.vmem [resolvable:$true] %s877_s12 }
  0x33   : > { %v448_v5 = vld [vmem:[#allocation6 + $0x50] sm:$0xff]  ;;  %v447_v6 = vld [vmem:[#allocation6 + $0x48] sm:$0xff]  ;;  %v446_v7 = vld [vmem:[#allocation6 + $0x40] sm:$0xff]  ;;  %s876_s11 = scalar_lea.hbm %s1864_s6, %s991_s20  ;;  %s865_s15 = scalar_lea.sflag [#allocation5], %s1408_s13 }
  0x34   : > { %993 = vmatpush.msra.mxu2 %v452_v1  ;;  %459 = vmatpush.msra.mxu0 %v452_v1  ;;  %v445_v8 = vld [vmem:[#allocation6 + $0x38] sm:$0xff]  ;;  %v444_v9 = vld [vmem:[#allocation6 + $0x30] sm:$0xff]  ;;  %v443_v10 = vld [vmem:[#allocation6 + $0x28] sm:$0xff]  ;;  %s879_s30 = sshll.u32 %s876_s11, 4  ;;  %s1207_s9 = scalar_lea.hbm %s1864_s6, 512  ;;  %s880_s30 = int_to_ptr.hbm [resolvable:$true] %s879_s30 }
  0x35   : > { %v442_v11 = vld [vmem:[#allocation6 + $0x20] sm:$0xff]  ;;  %v441_v12 = vld [vmem:[#allocation6 + $0x18] sm:$0xff]  ;;  %v440_v16 = vld [vmem:[#allocation6 + $0x10] sm:$0xff]  ;;  %s1201_s0 = sshra.s32 %s880_s30, 4  ;;  %s1202_s0 = int_to_ptr.hbm [resolvable:$true] %s1201_s0 }
  0x36   : > { %994 = vmatpush.msra.mxu2 %v451_v2  ;;  %460 = vmatpush.msra.mxu0 %v451_v2  ;;  %v1425_v13 = vld [vmem:[%s1414_s8 + $0x80] sm:$0xff]  ;;  %v439_v19 = vld [vmem:[#allocation6 + $0x8] sm:$0xff]  ;;  %v1455_v29 = vld [vmem:[%s1414_s8 + $0x90] sm:$0xff]  ;;  %s1203_s21 = scalar_lea.hbm %s1202_s0, 256  ;;  %p1208_p11 = scmp.lt.s32.totalorder %s1202_s0, %s1864_s6 }
  0x37   : > { %v1427_v14 = vstv %s308_s28  ;;  %v1430_v15 = vld [vmem:[%s1414_s8] sm:$0xff]  ;;  %vm357_vm0 = vcmp.gt.f32.partialorder %v1425_v13, 0.0  ;;  %v1441_v23 = vld [vmem:[%s1414_s8 + $0x88] sm:$0xff]  ;;  %v1458_v30 = vld [vmem:[%s1414_s8 + $0x10] sm:$0xff]  ;;  %vm359_vm4 = vcmp.gt.f32.partialorder %v1455_v29, 0.0  ;;  %p1204_p1 = scmp.ne.s32.totalorder %s1202_s0, %s1203_s21  ;;  %p1209_p2 = scmp.lt.s32.totalorder %s1207_s9, %s1203_s21 }
  0x38   : > { %995 = vmatpush.msra.mxu2 %v450_v3  ;;  %461 = vmatpush.msra.mxu0 %v450_v3  ;;  %v390_v17 = vmul.f32 %v1427_v14, %v1425_v13  ;;  %v374_v18 = vmul.f32 %v1427_v14, %v1430_v15  ;;  %vm341_vm1 = vcmp.gt.f32.partialorder %v1430_v15, 0.0  ;;  %v438_v20 = vld [vmem:[#allocation6] sm:$0xff]  ;;  %v1444_v24 = vld [vmem:[%s1414_s8 + $0x8] sm:$0xff]  ;;  %v391_v25 = vmul.f32 %v1427_v14, %v1441_v23  ;;  %v1469_v35 = vld [vmem:[%s1414_s8 + $0x98] sm:$0xff] }
  0x39   : > { %v375_v26 = vmul.f32 %v1427_v14, %v1444_v24  ;;  %vm358_vm2 = vcmp.gt.f32.partialorder %v1441_v23, 0.0  ;;  %vm342_vm3 = vcmp.gt.f32.partialorder %v1444_v24, 0.0  ;;  %v392_v31 = vmul.f32 %v1427_v14, %v1455_v29  ;;  %v1472_v36 = vld [vmem:[%s1414_s8 + $0x18] sm:$0xff]  ;;  %v1483_v41 = vld [vmem:[%s1414_s8 + $0xa0] sm:$0xff]  ;;  %v1497_v47 = vld [vmem:[%s1414_s8 + $0xa8] sm:$0xff]  ;;  %p1205_p4 = pnand %p1204_p1, %p1375_p3  ;;  %p1210_p9 = por %p1209_p2, %p1208_p11 }
  0x3a   : > { %996 = vmatpush.msra.mxu2 %v449_v4  ;;  %462 = vmatpush.msra.mxu0 %v449_v4  ;;  %v422_v21 = vsel %vm357_vm0, %v1425_v13, %v390_v17  ;;  %v406_v22 = vsel %vm341_vm1, %v1430_v15, %v374_v18  ;;  %v423_v27 = vsel %vm358_vm2, %v1441_v23, %v391_v25  ;;  %vm343_vm5 = vcmp.gt.f32.partialorder %v1458_v30, 0.0  ;;  %v1486_v42 = vld [vmem:[%s1414_s8 + $0x20] sm:$0xff]  ;;  %v1500_v48 = vld [vmem:[%s1414_s8 + $0x28] sm:$0xff]  ;;  %v1511_v53 = vld [vmem:[%s1414_s8 + $0xb0] sm:$0xff] }
  0x3b   : > { %v407_v28 = vsel %vm342_vm3, %v1444_v24, %v375_v26  ;;  %v376_v32 = vmul.f32 %v1427_v14, %v1458_v30  ;;  %v424_v33 = vsel %vm359_vm4, %v1455_v29, %v392_v31  ;;  %v393_v37 = vmul.f32 %v1427_v14, %v1469_v35  ;;  %v1514_v54 = vld [vmem:[%s1414_s8 + $0x30] sm:$0xff]  ;;  %v1525_v59 = vld [vmem:[%s1414_s8 + $0xb8] sm:$0xff]  ;;  %v1539_v1 = vld [vmem:[%s1414_s8 + $0xc0] sm:$0xff]  ;;  %p1206_p8 = pneg %p1205_p4 }
  0x3c   : > { %997 = vmatpush.msra.mxu2 %v448_v5  ;;  %463 = vmatpush.msra.mxu0 %v448_v5  ;;  %v377_v38 = vmul.f32 %v1427_v14, %v1472_v36  ;;  %vm360_vm6 = vcmp.gt.f32.partialorder %v1469_v35, 0.0  ;;  %vm344_vm7 = vcmp.gt.f32.partialorder %v1472_v36, 0.0  ;;  %v394_v43 = vmul.f32 %v1427_v14, %v1483_v41  ;;  %v1528_v60 = vld [vmem:[%s1414_s8 + $0x38] sm:$0xff]  ;;  %v1542_v2 = vld [vmem:[%s1414_s8 + $0x40] sm:$0xff]  ;;  %v1570_v17 = vld [vmem:[%s1414_s8 + $0x50] sm:$0xff] }
  0x3d   : > { %v408_v34 = vsel %vm343_vm5, %v1458_v30, %v376_v32  ;;  %v425_v39 = vsel %vm360_vm6, %v1469_v35, %v393_v37  ;;  %v378_v44 = vmul.f32 %v1427_v14, %v1486_v42  ;;  %vm361_vm8 = vcmp.gt.f32.partialorder %v1483_v41, 0.0  ;;  %v682_v18 = vld [vmem:[#allocation8 + $0x78] sm:$0xff]  ;;  %v679_v31 = vld [vmem:[#allocation8 + $0x60] sm:$0xff]  ;;  %v677_v37 = vld [vmem:[#allocation8 + $0x50] sm:$0xff]  ;;  %p1211_p10 = pnand %p1210_p9, %p1206_p8 }
  0x3e   : > { %998 = vmatpush.msra.mxu2 %v447_v6  ;;  %464 = vmatpush.msra.mxu0 %v447_v6  ;;  %v409_v40 = vsel %vm344_vm7, %v1472_v36, %v377_v38  ;;  %vm345_vm9 = vcmp.gt.f32.partialorder %v1486_v42, 0.0  ;;  %v426_v45 = vsel %vm361_vm8, %v1483_v41, %v394_v43  ;;  %v395_v49 = vmul.f32 %v1427_v14, %v1497_v47  ;;  %v678_v32 = vld [vmem:[#allocation8 + $0x58] sm:$0xff]  ;;  %v676_v38 = vld [vmem:[#allocation8 + $0x48] sm:$0xff]  ;;  %v1595_v43 = vld [vmem:[%s1414_s8 + $0xe0] sm:$0xff] }
  0x3f   : > { %v410_v46 = vsel %vm345_vm9, %v1486_v42, %v378_v44  ;;  %v379_v50 = vmul.f32 %v1427_v14, %v1500_v48  ;;  %vm362_vm10 = vcmp.gt.f32.partialorder %v1497_v47, 0.0  ;;  %vm346_vm11 = vcmp.gt.f32.partialorder %v1500_v48, 0.0  ;;  %1008 = vmatpush.msra.mxu3 %v682_v18  ;;  %687 = vmatpush.msra.mxu1 %v682_v18  ;;  %v1598_v44 = vld [vmem:[%s1414_s8 + $0x60] sm:$0xff] }
  0x40   : > { %999 = vmatpush.msra.mxu2 %v446_v7  ;;  %465 = vmatpush.msra.mxu0 %v446_v7  ;;  %v427_v51 = vsel %vm362_vm10, %v1497_v47, %v395_v49  ;;  %v396_v55 = vmul.f32 %v1427_v14, %v1511_v53  ;;  %v380_v56 = vmul.f32 %v1427_v14, %v1514_v54  ;;  %vm363_vm12 = vcmp.gt.f32.partialorder %v1511_v53, 0.0  ;;  %v1553_v7 = vld [vmem:[%s1414_s8 + $0xc8] sm:$0xff] }
  0x41   : > { %v411_v52 = vsel %vm346_vm11, %v1500_v48, %v379_v50  ;;  %vm347_vm13 = vcmp.gt.f32.partialorder %v1514_v54, 0.0  ;;  %v397_v61 = vmul.f32 %v1427_v14, %v1525_v59  ;;  %v381_v62 = vmul.f32 %v1427_v14, %v1528_v60 }
  0x42   : > { %1000 = vmatpush.msra.mxu2 %v445_v8  ;;  %466 = vmatpush.msra.mxu0 %v445_v8  ;;  %v428_v57 = vsel %vm363_vm12, %v1511_v53, %v396_v55  ;;  %v412_v58 = vsel %vm347_vm13, %v1514_v54, %v380_v56  ;;  %vm364_vm14 = vcmp.gt.f32.partialorder %v1525_v59, 0.0  ;;  %vm348_vm15 = vcmp.gt.f32.partialorder %v1528_v60, 0.0  ;;  %v1556_v8 = vld [vmem:[%s1414_s8 + $0x48] sm:$0xff] }
  0x43   : > { %v429_v63 = vsel %vm364_vm14, %v1525_v59, %v397_v61  ;;  %v413_v0 = vsel %vm348_vm15, %v1528_v60, %v381_v62  ;;  %v398_v3 = vmul.f32 %v1427_v14, %v1539_v1  ;;  %v382_v4 = vmul.f32 %v1427_v14, %v1542_v2  ;;  %v671_v61 = vld [vmem:[#allocation8 + $0x20] sm:$0xff]  ;;  %v670_v62 = vld [vmem:[#allocation8 + $0x18] sm:$0xff] }
  0x44   : > { %1001 = vmatpush.msra.mxu2 %v444_v9  ;;  %467 = vmatpush.msra.mxu0 %v444_v9  ;;  %vm365_vm0 = vcmp.gt.f32.partialorder %v1539_v1, 0.0  ;;  %vm349_vm1 = vcmp.gt.f32.partialorder %v1542_v2, 0.0  ;;  %v399_v9 = vmul.f32 %v1427_v14, %v1553_v7  ;;  %vm366_vm2 = vcmp.gt.f32.partialorder %v1553_v7, 0.0 }
  0x45   : > { %v430_v5 = vsel %vm365_vm0, %v1539_v1, %v398_v3  ;;  %v414_v6 = vsel %vm349_vm1, %v1542_v2, %v382_v4  ;;  %vm350_vm3 = vcmp.gt.f32.partialorder %v1556_v8, 0.0  ;;  %vm351_vm5 = vcmp.gt.f32.partialorder %v1570_v17, 0.0  ;;  %v669_v3 = vld [vmem:[#allocation8 + $0x10] sm:$0xff]  ;;  %v668_v4 = vld [vmem:[#allocation8 + $0x8] sm:$0xff] }
  0x46   : > { %1002 = vmatpush.msra.mxu2 %v443_v10  ;;  %468 = vmatpush.msra.mxu0 %v443_v10  ;;  %v383_v10 = vmul.f32 %v1427_v14, %v1556_v8  ;;  %v402_v49 = vmul.f32 %v1427_v14, %v1595_v43  ;;  %v386_v50 = vmul.f32 %v1427_v14, %v1598_v44  ;;  %vm369_vm8 = vcmp.gt.f32.partialorder %v1595_v43, 0.0 }
  0x47   : > { %vm353_vm9 = vcmp.gt.f32.partialorder %v1598_v44, 0.0 }
  0x48   : > { %1003 = vmatpush.msra.mxu2 %v442_v11  ;;  %469 = vmatpush.msra.mxu0 %v442_v11  ;;  %v431_v11 = vsel %vm366_vm2, %v1553_v7, %v399_v9  ;;  %v434_v55 = vsel %vm369_vm8, %v1595_v43, %v402_v49  ;;  %v418_v56 = vsel %vm353_vm9, %v1598_v44, %v386_v50  ;;  %v1623_v9 = vld [vmem:[%s1414_s8 + $0xf0] sm:$0xff] }
  0x49   : > { %vm371_vm12 = vcmp.gt.f32.partialorder %v1623_v9, 0.0 }
  0x4a   : > { %1004 = vmatpush.msra.mxu2 %v441_v12  ;;  %470 = vmatpush.msra.mxu0 %v441_v12  ;;  %v415_v12 = vsel %vm350_vm3, %v1556_v8, %v383_v10  ;;  %v1626_v10 = vld [vmem:[%s1414_s8 + $0x70] sm:$0xff] }
  0x4b   : > { %v388_v18 = vmul.f32 %v1427_v14, %v1626_v10  ;;  %vm355_vm13 = vcmp.gt.f32.partialorder %v1626_v10, 0.0 }
  0x4c   : > { %1005 = vmatpush.msra.mxu2 %v440_v16  ;;  %471 = vmatpush.msra.mxu0 %v440_v16  ;;  %v1567_v16 = vld [vmem:[%s1414_s8 + $0xd0] sm:$0xff] }
  0x4d   : > { %vm367_vm4 = vcmp.gt.f32.partialorder %v1567_v16, 0.0 }
  0x4e   : > { %1006 = vmatpush.msra.mxu2 %v439_v19  ;;  %472 = vmatpush.msra.mxu0 %v439_v19  ;;  %v681_v19 = vld [vmem:[#allocation8 + $0x70] sm:$0xff] }
  0x4f   : > { %1009 = vmatpush.msra.mxu3 %v681_v19  ;;  %688 = vmatpush.msra.mxu1 %v681_v19 }
  0x50   : > { %1007 = vmatpush.msra.mxu2 %v438_v20  ;;  %473 = vmatpush.msra.mxu0 %v438_v20  ;;  %v400_v20 = vmul.f32 %v1427_v14, %v1567_v16 }
  0x51   : > { %522 = vmatmul.f32.vlgmr.msra.gmra.mxu2 %v422_v21  ;;  %474 = vmatmul.f32.vlgmr.msra.gmra.mxu0 %v406_v22  ;;  %v384_v21 = vmul.f32 %v1427_v14, %v1570_v17  ;;  %v680_v22 = vld [vmem:[#allocation8 + $0x68] sm:$0xff] }
  0x52   : > { %v432_v25 = vsel %vm367_vm4, %v1567_v16, %v400_v20  ;;  %1010 = vmatpush.msra.mxu3 %v680_v22  ;;  %689 = vmatpush.msra.mxu1 %v680_v22  ;;  %v420_v20 = vsel %vm355_vm13, %v1626_v10, %v388_v18  ;;  %v1640_v22 = vld [vmem:[%s1414_s8 + $0x78] sm:$0xff] }
  0x53   : > { %v416_v26 = vsel %vm351_vm5, %v1570_v17, %v384_v21  ;;  %v1637_v21 = vld [vmem:[%s1414_s8 + $0xf8] sm:$0xff]  ;;  %vm356_vm15 = vcmp.gt.f32.partialorder %v1640_v22, 0.0 }
  0x54   : > { %1011 = vmatpush.msra.mxu3 %v679_v31  ;;  %690 = vmatpush.msra.mxu1 %v679_v31  ;;  %vm372_vm14 = vcmp.gt.f32.partialorder %v1637_v21, 0.0 }
  0x56   : > { %1012 = vmatpush.msra.mxu3 %v678_v32  ;;  %691 = vmatpush.msra.mxu1 %v678_v32 }
  0x58   : > { %1013 = vmatpush.msra.mxu3 %v677_v37  ;;  %692 = vmatpush.msra.mxu1 %v677_v37 }
  0x59   : > { %525 = vmatmul.f32.gmra.mxu2 %v423_v27  ;;  %477 = vmatmul.f32.gmra.mxu0 %v407_v28  ;;  %v1581_v27 = vld [vmem:[%s1414_s8 + $0xd8] sm:$0xff] }
  0x5a   : > { %v1584_v28 = vld [vmem:[%s1414_s8 + $0x58] sm:$0xff]  ;;  %vm368_vm6 = vcmp.gt.f32.partialorder %v1581_v27, 0.0  ;;  %1014 = vmatpush.msra.mxu3 %v676_v38  ;;  %693 = vmatpush.msra.mxu1 %v676_v38 }
  0x5b   : > { %vm352_vm7 = vcmp.gt.f32.partialorder %v1584_v28, 0.0 }
  0x61   : > { %528 = vmatmul.f32.gmra.mxu2 %v424_v33  ;;  %480 = vmatmul.f32.gmra.mxu0 %v408_v34  ;;  %v401_v33 = vmul.f32 %v1427_v14, %v1581_v27  ;;  %v385_v34 = vmul.f32 %v1427_v14, %v1584_v28 }
  0x69   : > { %531 = vmatmul.f32.gmra.mxu2 %v425_v39  ;;  %483 = vmatmul.f32.gmra.mxu0 %v409_v40  ;;  %v433_v39 = vsel %vm368_vm6, %v1581_v27, %v401_v33  ;;  %v417_v40 = vsel %vm352_vm7, %v1584_v28, %v385_v34  ;;  %v1653_v33 = vld [vmem:[%s1861_s3] ss:$0 sm:$0xff] }
  0x71   : > { %534 = vmatmul.f32.gmra.mxu2 %v426_v45  ;;  %486 = vmatmul.f32.gmra.mxu0 %v410_v46  ;;  %v675_v45 = vld [vmem:[#allocation8 + $0x40] sm:$0xff]  ;;  %v674_v46 = vld [vmem:[#allocation8 + $0x38] sm:$0xff] }
  0x72   : > { %1015 = vmatpush.msra.mxu3 %v675_v45  ;;  %694 = vmatpush.msra.mxu1 %v675_v45 }
  0x74   : > { %1016 = vmatpush.msra.mxu3 %v674_v46  ;;  %695 = vmatpush.msra.mxu1 %v674_v46 }
  0x79   : > { %537 = vmatmul.f32.gmra.mxu2 %v427_v51  ;;  %489 = vmatmul.f32.gmra.mxu0 %v411_v52  ;;  %v673_v51 = vld [vmem:[#allocation8 + $0x30] sm:$0xff]  ;;  %v672_v52 = vld [vmem:[#allocation8 + $0x28] sm:$0xff] }
  0x7a   : > { %1017 = vmatpush.msra.mxu3 %v673_v51  ;;  %696 = vmatpush.msra.mxu1 %v673_v51 }
  0x7c   : > { %1018 = vmatpush.msra.mxu3 %v672_v52  ;;  %697 = vmatpush.msra.mxu1 %v672_v52 }
  0x7e   : > { %1019 = vmatpush.msra.mxu3 %v671_v61  ;;  %698 = vmatpush.msra.mxu1 %v671_v61 }
  0x80   : > { %1020 = vmatpush.msra.mxu3 %v670_v62  ;;  %699 = vmatpush.msra.mxu1 %v670_v62 }
  0x81   : > { %540 = vmatmul.f32.gmra.mxu2 %v428_v57  ;;  %492 = vmatmul.f32.gmra.mxu0 %v412_v58  ;;  %v1609_v57 = vld [vmem:[%s1414_s8 + $0xe8] sm:$0xff] }
  0x82   : > { %v1612_v58 = vld [vmem:[%s1414_s8 + $0x68] sm:$0xff]  ;;  %vm370_vm10 = vcmp.gt.f32.partialorder %v1609_v57, 0.0  ;;  %1021 = vmatpush.msra.mxu3 %v669_v3  ;;  %700 = vmatpush.msra.mxu1 %v669_v3 }
  0x83   : > { %vm354_vm11 = vcmp.gt.f32.partialorder %v1612_v58, 0.0 }
  0x84   : > { %1022 = vmatpush.msra.mxu3 %v668_v4  ;;  %701 = vmatpush.msra.mxu1 %v668_v4 }
  0x89   : > { %543 = vmatmul.f32.gmra.mxu2 %v429_v63  ;;  %495 = vmatmul.f32.gmra.mxu0 %v413_v0  ;;  %v403_v63 = vmul.f32 %v1427_v14, %v1609_v57  ;;  %v387_v0 = vmul.f32 %v1427_v14, %v1612_v58 }
  0x91   : > { %546 = vmatmul.f32.gmra.mxu2 %v430_v5  ;;  %498 = vmatmul.f32.gmra.mxu0 %v414_v6  ;;  %v435_v5 = vsel %vm370_vm10, %v1609_v57, %v403_v63  ;;  %v419_v6 = vsel %vm354_vm11, %v1612_v58, %v387_v0 }
  0x99   : > { %549 = vmatmul.f32.gmra.mxu2 %v431_v11  ;;  %501 = vmatmul.f32.gmra.mxu0 %v415_v12  ;;  %v667_v11 = vld [vmem:[#allocation8] sm:$0xff]  ;;  %v404_v12 = vmul.f32 %v1427_v14, %v1623_v9 }
  0x9a   : > { %1023 = vmatpush.msra.mxu3 %v667_v11  ;;  %702 = vmatpush.msra.mxu1 %v667_v11 }
  0x9b   : > { %v436_v19 = vsel %vm371_vm12, %v1623_v9, %v404_v12 }
  0xa1   : > { %552 = vmatmul.f32.gmra.mxu2 %v432_v25  ;;  %504 = vmatmul.f32.gmra.mxu0 %v416_v26  ;;  %v405_v25 = vmul.f32 %v1427_v14, %v1637_v21  ;;  %v389_v26 = vmul.f32 %v1427_v14, %v1640_v22 }
  0xa3   : > { %v437_v31 = vsel %vm372_vm14, %v1637_v21, %v405_v25  ;;  %v421_v32 = vsel %vm356_vm15, %v1640_v22, %v389_v26 }
  0xa9   : > { %555 = vmatmul.f32.gmra.mxu2 %v433_v39  ;;  %507 = vmatmul.f32.gmra.mxu0 %v417_v40 }
  0xb1   : > { %558 = vmatmul.f32.gmra.mxu2 %v434_v55  ;;  %510 = vmatmul.f32.gmra.mxu0 %v418_v56 }
  0xb9   : > { %561 = vmatmul.f32.gmra.mxu2 %v435_v5  ;;  %513 = vmatmul.f32.gmra.mxu0 %v419_v6 }
  0xc1   : > { %564 = vmatmul.f32.gmra.mxu2 %v436_v19  ;;  %516 = vmatmul.f32.gmra.mxu0 %v420_v20 }
  0xc9   : > { %567 = vmatmul.f32.gmra.mxu2 %v437_v31  ;;  %519 = vmatmul.f32.gmra.mxu0 %v421_v32 }
  0xce   : > { %v475_v34 = vpop.f32.mrf.mxu0 }
  0xcf   : > { %v476_v37 = vadd.f32 %v1653_v33, %v475_v34 }
  0xd1   : > { %vm571_vm0 = vcmp.gt.f32.partialorder %v476_v37, 0.0  ;;  %v603_v38 = vmul.f32 %v476_v37, %v1427_v14 }
  0xd3   : > { %v635_v39 = vsel %vm571_vm0, %v476_v37, %v603_v38 }
  0xd4   : > { %v523_v40 = vpop.f32.mrf.mxu2  ;;  %703 = vmatmul.f32.vlgmr.msra.gmra.mxu1 %v635_v39 }
  0xd5   : > { %v524_v45 = vadd.f32 %v1653_v33, %v523_v40 }
  0xd6   : > { %v478_v46 = vpop.f32.mrf.mxu0 }
  0xd7   : > { %vm587_vm1 = vcmp.gt.f32.partialorder %v524_v45, 0.0  ;;  %v619_v49 = vmul.f32 %v524_v45, %v1427_v14  ;;  %v479_v50 = vadd.f32 %v1653_v33, %v478_v46 }
  0xd9   : > { %v651_v51 = vsel %vm587_vm1, %v524_v45, %v619_v49  ;;  %vm572_vm2 = vcmp.gt.f32.partialorder %v479_v50, 0.0  ;;  %v604_v52 = vmul.f32 %v479_v50, %v1427_v14 }
  0xda   : > { %751 = vmatmul.f32.vlgmr.msra.gmra.mxu3 %v651_v51 }
  0xdb   : > { %v636_v55 = vsel %vm572_vm2, %v479_v50, %v604_v52 }
  0xdc   : > { %v526_v56 = vpop.f32.mrf.mxu2  ;;  %706 = vmatmul.f32.gmra.mxu1 %v636_v55 }
  0xdd   : > { %v527_v61 = vadd.f32 %v1653_v33, %v526_v56 }
  0xde   : > { %v481_v62 = vpop.f32.mrf.mxu0 }
  0xdf   : > { %vm588_vm3 = vcmp.gt.f32.partialorder %v527_v61, 0.0  ;;  %v620_v63 = vmul.f32 %v527_v61, %v1427_v14  ;;  %v482_v0 = vadd.f32 %v1653_v33, %v481_v62 }
  0xe1   : > { %v652_v3 = vsel %vm588_vm3, %v527_v61, %v620_v63  ;;  %vm573_vm4 = vcmp.gt.f32.partialorder %v482_v0, 0.0  ;;  %v605_v4 = vmul.f32 %v482_v0, %v1427_v14 }
  0xe2   : > { %754 = vmatmul.f32.gmra.mxu3 %v652_v3 }
  0xe3   : > { %v637_v5 = vsel %vm573_vm4, %v482_v0, %v605_v4 }
  0xe4   : > { %v529_v6 = vpop.f32.mrf.mxu2  ;;  %709 = vmatmul.f32.gmra.mxu1 %v637_v5 }
  0xe5   : > { %v530_v11 = vadd.f32 %v1653_v33, %v529_v6 }
  0xe6   : > { %v484_v12 = vpop.f32.mrf.mxu0 }
  0xe7   : > { %vm589_vm5 = vcmp.gt.f32.partialorder %v530_v11, 0.0  ;;  %v621_v18 = vmul.f32 %v530_v11, %v1427_v14  ;;  %v485_v19 = vadd.f32 %v1653_v33, %v484_v12 }
  0xe9   : > { %v653_v20 = vsel %vm589_vm5, %v530_v11, %v621_v18  ;;  %vm574_vm6 = vcmp.gt.f32.partialorder %v485_v19, 0.0  ;;  %v606_v25 = vmul.f32 %v485_v19, %v1427_v14 }
  0xea   : > { %757 = vmatmul.f32.gmra.mxu3 %v653_v20 }
  0xeb   : > { %v638_v26 = vsel %vm574_vm6, %v485_v19, %v606_v25 }
  0xec   : > { %v532_v31 = vpop.f32.mrf.mxu2  ;;  %712 = vmatmul.f32.gmra.mxu1 %v638_v26 }
  0xed   : > { %v533_v32 = vadd.f32 %v1653_v33, %v532_v31 }
  0xee   : > { %v487_v34 = vpop.f32.mrf.mxu0 }
  0xef   : > { %vm590_vm7 = vcmp.gt.f32.partialorder %v533_v32, 0.0  ;;  %v622_v37 = vmul.f32 %v533_v32, %v1427_v14  ;;  %v488_v38 = vadd.f32 %v1653_v33, %v487_v34 }
  0xf1   : > { %v654_v39 = vsel %vm590_vm7, %v533_v32, %v622_v37  ;;  %vm575_vm8 = vcmp.gt.f32.partialorder %v488_v38, 0.0  ;;  %v607_v40 = vmul.f32 %v488_v38, %v1427_v14 }
  0xf2   : > { %760 = vmatmul.f32.gmra.mxu3 %v654_v39 }
  0xf3   : > { %v639_v45 = vsel %vm575_vm8, %v488_v38, %v607_v40 }
  0xf4   : > { %v535_v46 = vpop.f32.mrf.mxu2  ;;  %715 = vmatmul.f32.gmra.mxu1 %v639_v45 }
  0xf5   : > { %v536_v49 = vadd.f32 %v1653_v33, %v535_v46 }
  0xf6   : > { %v490_v50 = vpop.f32.mrf.mxu0 }
  0xf7   : > { %vm591_vm9 = vcmp.gt.f32.partialorder %v536_v49, 0.0  ;;  %v623_v51 = vmul.f32 %v536_v49, %v1427_v14  ;;  %v491_v52 = vadd.f32 %v1653_v33, %v490_v50 }
  0xf9   : > { %v655_v55 = vsel %vm591_vm9, %v536_v49, %v623_v51  ;;  %vm576_vm10 = vcmp.gt.f32.partialorder %v491_v52, 0.0  ;;  %v608_v56 = vmul.f32 %v491_v52, %v1427_v14 }
  0xfa   : > { %763 = vmatmul.f32.gmra.mxu3 %v655_v55 }
  0xfb   : > { %v640_v61 = vsel %vm576_vm10, %v491_v52, %v608_v56 }
  0xfc   : > { %v538_v62 = vpop.f32.mrf.mxu2  ;;  %718 = vmatmul.f32.gmra.mxu1 %v640_v61 }
  0xfd   : > { %v539_v63 = vadd.f32 %v1653_v33, %v538_v62 }
  0xfe   : > { %v493_v0 = vpop.f32.mrf.mxu0 }
  0xff   : > { %vm592_vm11 = vcmp.gt.f32.partialorder %v539_v63, 0.0  ;;  %v624_v3 = vmul.f32 %v539_v63, %v1427_v14  ;;  %v494_v4 = vadd.f32 %v1653_v33, %v493_v0 }
 0x101   : > { %v656_v5 = vsel %vm592_vm11, %v539_v63, %v624_v3  ;;  %vm577_vm12 = vcmp.gt.f32.partialorder %v494_v4, 0.0  ;;  %v609_v6 = vmul.f32 %v494_v4, %v1427_v14 }
 0x102   : > { %766 = vmatmul.f32.gmra.mxu3 %v656_v5 }
 0x103   : > { %v641_v11 = vsel %vm577_vm12, %v494_v4, %v609_v6 }
 0x104   : > { %v541_v12 = vpop.f32.mrf.mxu2  ;;  %721 = vmatmul.f32.gmra.mxu1 %v641_v11 }
 0x105   : > { %v542_v18 = vadd.f32 %v1653_v33, %v541_v12 }
 0x106   : > { %v496_v19 = vpop.f32.mrf.mxu0 }
 0x107   : > { %vm593_vm13 = vcmp.gt.f32.partialorder %v542_v18, 0.0  ;;  %v625_v20 = vmul.f32 %v542_v18, %v1427_v14  ;;  %v497_v25 = vadd.f32 %v1653_v33, %v496_v19 }
 0x109   : > { %v657_v26 = vsel %vm593_vm13, %v542_v18, %v625_v20  ;;  %vm578_vm14 = vcmp.gt.f32.partialorder %v497_v25, 0.0  ;;  %v610_v31 = vmul.f32 %v497_v25, %v1427_v14 }
 0x10a   : > { %769 = vmatmul.f32.gmra.mxu3 %v657_v26 }
 0x10b   : > { %v642_v32 = vsel %vm578_vm14, %v497_v25, %v610_v31 }
 0x10c   : > { %v544_v34 = vpop.f32.mrf.mxu2  ;;  %724 = vmatmul.f32.gmra.mxu1 %v642_v32 }
 0x10d   : > { %v545_v37 = vadd.f32 %v1653_v33, %v544_v34 }
 0x10e   : > { %v499_v38 = vpop.f32.mrf.mxu0 }
 0x10f   : > { %vm594_vm15 = vcmp.gt.f32.partialorder %v545_v37, 0.0  ;;  %v626_v39 = vmul.f32 %v545_v37, %v1427_v14  ;;  %v500_v40 = vadd.f32 %v1653_v33, %v499_v38 }
 0x111   : > { %v658_v45 = vsel %vm594_vm15, %v545_v37, %v626_v39  ;;  %vm579_vm0 = vcmp.gt.f32.partialorder %v500_v40, 0.0  ;;  %v611_v46 = vmul.f32 %v500_v40, %v1427_v14 }
 0x112   : > { %772 = vmatmul.f32.gmra.mxu3 %v658_v45 }
 0x113   : > { %v643_v49 = vsel %vm579_vm0, %v500_v40, %v611_v46 }
 0x114   : > { %v547_v50 = vpop.f32.mrf.mxu2  ;;  %727 = vmatmul.f32.gmra.mxu1 %v643_v49 }
 0x115   : > { %v548_v51 = vadd.f32 %v1653_v33, %v547_v50 }
 0x116   : > { %v502_v52 = vpop.f32.mrf.mxu0 }
 0x117   : > { %vm595_vm1 = vcmp.gt.f32.partialorder %v548_v51, 0.0  ;;  %v627_v55 = vmul.f32 %v548_v51, %v1427_v14  ;;  %v503_v56 = vadd.f32 %v1653_v33, %v502_v52 }
 0x119   : > { %v659_v61 = vsel %vm595_vm1, %v548_v51, %v627_v55  ;;  %vm580_vm2 = vcmp.gt.f32.partialorder %v503_v56, 0.0  ;;  %v612_v62 = vmul.f32 %v503_v56, %v1427_v14 }
 0x11a   : > { %775 = vmatmul.f32.gmra.mxu3 %v659_v61 }
 0x11b   : > { %v644_v63 = vsel %vm580_vm2, %v503_v56, %v612_v62 }
 0x11c   : > { %v550_v0 = vpop.f32.mrf.mxu2  ;;  %730 = vmatmul.f32.gmra.mxu1 %v644_v63 }
 0x11d   : > { %v551_v3 = vadd.f32 %v1653_v33, %v550_v0 }
 0x11e   : > { %v505_v4 = vpop.f32.mrf.mxu0 }
 0x11f   : > { %vm596_vm3 = vcmp.gt.f32.partialorder %v551_v3, 0.0  ;;  %v628_v5 = vmul.f32 %v551_v3, %v1427_v14  ;;  %v506_v6 = vadd.f32 %v1653_v33, %v505_v4 }
 0x121   : > { %v660_v11 = vsel %vm596_vm3, %v551_v3, %v628_v5  ;;  %vm581_vm4 = vcmp.gt.f32.partialorder %v506_v6, 0.0  ;;  %v613_v12 = vmul.f32 %v506_v6, %v1427_v14 }
 0x122   : > { %778 = vmatmul.f32.gmra.mxu3 %v660_v11 }
 0x123   : > { %v645_v18 = vsel %vm581_vm4, %v506_v6, %v613_v12 }
 0x124   : > { %v553_v19 = vpop.f32.mrf.mxu2  ;;  %733 = vmatmul.f32.gmra.mxu1 %v645_v18 }
 0x125   : > { %v554_v20 = vadd.f32 %v1653_v33, %v553_v19 }
 0x126   : > { %v508_v25 = vpop.f32.mrf.mxu0 }
 0x127   : > { %vm597_vm5 = vcmp.gt.f32.partialorder %v554_v20, 0.0  ;;  %v629_v26 = vmul.f32 %v554_v20, %v1427_v14  ;;  %v509_v31 = vadd.f32 %v1653_v33, %v508_v25 }
 0x129   : > { %v661_v32 = vsel %vm597_vm5, %v554_v20, %v629_v26  ;;  %vm582_vm6 = vcmp.gt.f32.partialorder %v509_v31, 0.0  ;;  %v614_v34 = vmul.f32 %v509_v31, %v1427_v14 }
 0x12a   : > { %781 = vmatmul.f32.gmra.mxu3 %v661_v32 }
 0x12b   : > { %v646_v37 = vsel %vm582_vm6, %v509_v31, %v614_v34 }
 0x12c   : > { %v556_v38 = vpop.f32.mrf.mxu2  ;;  %736 = vmatmul.f32.gmra.mxu1 %v646_v37 }
 0x12d   : > { %v557_v39 = vadd.f32 %v1653_v33, %v556_v38 }
 0x12e   : > { %v511_v40 = vpop.f32.mrf.mxu0 }
 0x12f   : > { %vm598_vm7 = vcmp.gt.f32.partialorder %v557_v39, 0.0  ;;  %v630_v45 = vmul.f32 %v557_v39, %v1427_v14  ;;  %v512_v46 = vadd.f32 %v1653_v33, %v511_v40 }
 0x131   : > { %v662_v49 = vsel %vm598_vm7, %v557_v39, %v630_v45  ;;  %vm583_vm8 = vcmp.gt.f32.partialorder %v512_v46, 0.0  ;;  %v615_v50 = vmul.f32 %v512_v46, %v1427_v14 }
 0x132   : > { %784 = vmatmul.f32.gmra.mxu3 %v662_v49 }
 0x133   : > { %v647_v51 = vsel %vm583_vm8, %v512_v46, %v615_v50  ;;  %v1721_v46 = vld [vmem:[%s1863_s5] ss:$0 sm:$0xff] }
 0x134   : > { %v559_v52 = vpop.f32.mrf.mxu2  ;;  %739 = vmatmul.f32.gmra.mxu1 %v647_v51 }
 0x135   : > { %v560_v55 = vadd.f32 %v1653_v33, %v559_v52 }
 0x136   : > { %v514_v56 = vpop.f32.mrf.mxu0 }
 0x137   : > { %vm599_vm9 = vcmp.gt.f32.partialorder %v560_v55, 0.0  ;;  %v631_v61 = vmul.f32 %v560_v55, %v1427_v14  ;;  %v515_v62 = vadd.f32 %v1653_v33, %v514_v56 }
 0x139   : > { %v663_v63 = vsel %vm599_vm9, %v560_v55, %v631_v61  ;;  %vm584_vm10 = vcmp.gt.f32.partialorder %v515_v62, 0.0  ;;  %v616_v0 = vmul.f32 %v515_v62, %v1427_v14 }
 0x13a   : > { %787 = vmatmul.f32.gmra.mxu3 %v663_v63 }
 0x13b   : > { %v648_v3 = vsel %vm584_vm10, %v515_v62, %v616_v0 }
 0x13c   : > { %v562_v4 = vpop.f32.mrf.mxu2  ;;  %742 = vmatmul.f32.gmra.mxu1 %v648_v3 }
 0x13d   : > { %v563_v5 = vadd.f32 %v1653_v33, %v562_v4 }
 0x13e   : > { %v517_v6 = vpop.f32.mrf.mxu0 }
 0x13f   : > { %vm600_vm11 = vcmp.gt.f32.partialorder %v563_v5, 0.0  ;;  %v632_v11 = vmul.f32 %v563_v5, %v1427_v14  ;;  %v518_v12 = vadd.f32 %v1653_v33, %v517_v6 }
 0x141   : > { %v664_v18 = vsel %vm600_vm11, %v563_v5, %v632_v11  ;;  %vm585_vm12 = vcmp.gt.f32.partialorder %v518_v12, 0.0  ;;  %v617_v19 = vmul.f32 %v518_v12, %v1427_v14 }
 0x142   : > { %790 = vmatmul.f32.gmra.mxu3 %v664_v18 }
 0x143   : > { %v649_v20 = vsel %vm585_vm12, %v518_v12, %v617_v19 }
 0x144   : > { %v565_v25 = vpop.f32.mrf.mxu2  ;;  %745 = vmatmul.f32.gmra.mxu1 %v649_v20 }
 0x145   : > { %v566_v26 = vadd.f32 %v1653_v33, %v565_v25 }
 0x146   : > { %v520_v31 = vpop.f32.mrf.mxu0 }
 0x147   : > { %vm601_vm13 = vcmp.gt.f32.partialorder %v566_v26, 0.0  ;;  %v633_v32 = vmul.f32 %v566_v26, %v1427_v14  ;;  %v521_v34 = vadd.f32 %v1653_v33, %v520_v31 }
 0x149   : > { %v665_v37 = vsel %vm601_vm13, %v566_v26, %v633_v32  ;;  %vm586_vm14 = vcmp.gt.f32.partialorder %v521_v34, 0.0  ;;  %v618_v38 = vmul.f32 %v521_v34, %v1427_v14 }
 0x14a   : > { %793 = vmatmul.f32.gmra.mxu3 %v665_v37 }
 0x14b   : > { %v650_v39 = vsel %vm586_vm14, %v521_v34, %v618_v38 }
 0x14c   : > { %v568_v40 = vpop.f32.mrf.mxu2  ;;  %748 = vmatmul.f32.gmra.mxu1 %v650_v39 }
 0x14d   : > { %v569_v45 = vadd.f32 %v1653_v33, %v568_v40 }
 0x14f   : > { %vm602_vm15 = vcmp.gt.f32.partialorder %v569_v45, 0.0  ;;  %v634_v49 = vmul.f32 %v569_v45, %v1427_v14 }
 0x151   : > { %v666_v50 = vsel %vm602_vm15, %v569_v45, %v634_v49  ;;  %v704_v51 = vpop.f32.mrf.mxu1 }
 0x152   : > { %796 = vmatmul.f32.gmra.mxu3 %v666_v50  ;;  %v705_v52 = vadd.f32 %v1721_v46, %v704_v51 }
 0x154   : > { %v800_v55 = vadd.f32 %v705_v52, %v1430_v15 }
 0x156   : > { %832 = vst [vmem:[%s1728_s18] sm:$0xff] %v800_v55 }
 0x159   : > { %v707_v33 = vpop.f32.mrf.mxu1 }
 0x15a   : > { %v708_v56 = vadd.f32 %v1721_v46, %v707_v33 }
 0x15c   : > { %v801_v14 = vadd.f32 %v708_v56, %v1444_v24 }
 0x15d   : > { %v752_v61 = vpop.f32.mrf.mxu3 }
 0x15e   : > { %v753_v62 = vadd.f32 %v1721_v46, %v752_v61  ;;  %833 = vst [vmem:[%s1728_s18 + $0x8] sm:$0xff] %v801_v14 }
 0x160   : > { %v816_v15 = vadd.f32 %v753_v62, %v1425_v13 }
 0x161   : > { %v710_v63 = vpop.f32.mrf.mxu1 }
 0x162   : > { %848 = vst [vmem:[%s1728_s18 + $0x80] sm:$0xff] %v816_v15  ;;  %v711_v0 = vadd.f32 %v1721_v46, %v710_v63 }
 0x164   : > { %v802_v3 = vadd.f32 %v711_v0, %v1458_v30 }
 0x165   : > { %v755_v4 = vpop.f32.mrf.mxu3 }
 0x166   : > { %v756_v5 = vadd.f32 %v1721_v46, %v755_v4  ;;  %834 = vst [vmem:[%s1728_s18 + $0x10] sm:$0xff] %v802_v3 }
 0x168   : > { %v817_v24 = vadd.f32 %v756_v5, %v1441_v23 }
 0x169   : > { %v713_v6 = vpop.f32.mrf.mxu1 }
 0x16a   : > { %849 = vst [vmem:[%s1728_s18 + $0x88] sm:$0xff] %v817_v24  ;;  %v714_v11 = vadd.f32 %v1721_v46, %v713_v6 }
 0x16c   : > { %v803_v13 = vadd.f32 %v714_v11, %v1472_v36 }
 0x16d   : > { %v758_v12 = vpop.f32.mrf.mxu3 }
 0x16e   : > { %v759_v18 = vadd.f32 %v1721_v46, %v758_v12  ;;  %835 = vst [vmem:[%s1728_s18 + $0x18] sm:$0xff] %v803_v13 }
 0x170   : > { %v818_v30 = vadd.f32 %v759_v18, %v1455_v29 }
 0x171   : > { %v716_v19 = vpop.f32.mrf.mxu1 }
 0x172   : > { %850 = vst [vmem:[%s1728_s18 + $0x90] sm:$0xff] %v818_v30  ;;  %v717_v20 = vadd.f32 %v1721_v46, %v716_v19 }
 0x174   : > { %v804_v23 = vadd.f32 %v717_v20, %v1486_v42 }
 0x175   : > { %v761_v25 = vpop.f32.mrf.mxu3 }
 0x176   : > { %v762_v26 = vadd.f32 %v1721_v46, %v761_v25  ;;  %836 = vst [vmem:[%s1728_s18 + $0x20] sm:$0xff] %v804_v23 }
 0x178   : > { %v819_v36 = vadd.f32 %v762_v26, %v1469_v35 }
 0x179   : > { %v719_v31 = vpop.f32.mrf.mxu1 }
 0x17a   : > { %851 = vst [vmem:[%s1728_s18 + $0x98] sm:$0xff] %v819_v36  ;;  %v720_v32 = vadd.f32 %v1721_v46, %v719_v31 }
 0x17c   : > { %v805_v29 = vadd.f32 %v720_v32, %v1500_v48 }
 0x17d   : > { %v764_v34 = vpop.f32.mrf.mxu3 }
 0x17e   : > { %v765_v37 = vadd.f32 %v1721_v46, %v764_v34  ;;  %837 = vst [vmem:[%s1728_s18 + $0x28] sm:$0xff] %v805_v29 }
 0x180   : > { %v820_v42 = vadd.f32 %v765_v37, %v1483_v41 }
 0x181   : > { %v722_v38 = vpop.f32.mrf.mxu1 }
 0x182   : > { %852 = vst [vmem:[%s1728_s18 + $0xa0] sm:$0xff] %v820_v42  ;;  %v723_v39 = vadd.f32 %v1721_v46, %v722_v38 }
 0x184   : > { %v806_v35 = vadd.f32 %v723_v39, %v1514_v54 }
 0x185   : > { %v767_v40 = vpop.f32.mrf.mxu3 }
 0x186   : > { %v768_v45 = vadd.f32 %v1721_v46, %v767_v40  ;;  %838 = vst [vmem:[%s1728_s18 + $0x30] sm:$0xff] %v806_v35 }
 0x188   : > { %v821_v48 = vadd.f32 %v768_v45, %v1497_v47 }
 0x189   : > { %v725_v49 = vpop.f32.mrf.mxu1 }
 0x18a   : > { %853 = vst [vmem:[%s1728_s18 + $0xa8] sm:$0xff] %v821_v48  ;;  %v726_v50 = vadd.f32 %v1721_v46, %v725_v49 }
 0x18c   : > { %v807_v41 = vadd.f32 %v726_v50, %v1528_v60 }
 0x18d   : > { %v770_v51 = vpop.f32.mrf.mxu3 }
 0x18e   : > { %v771_v52 = vadd.f32 %v1721_v46, %v770_v51  ;;  %839 = vst [vmem:[%s1728_s18 + $0x38] sm:$0xff] %v807_v41 }
 0x190   : > { %v822_v54 = vadd.f32 %v771_v52, %v1511_v53 }
 0x191   : > { %v728_v55 = vpop.f32.mrf.mxu1 }
 0x192   : > { %854 = vst [vmem:[%s1728_s18 + $0xb0] sm:$0xff] %v822_v54  ;;  %v729_v33 = vadd.f32 %v1721_v46, %v728_v55 }
 0x194   : > { %v808_v47 = vadd.f32 %v729_v33, %v1542_v2 }
 0x195   : > { %v773_v56 = vpop.f32.mrf.mxu3 }
 0x196   : > { %v774_v14 = vadd.f32 %v1721_v46, %v773_v56  ;;  %840 = vst [vmem:[%s1728_s18 + $0x40] sm:$0xff] %v808_v47 }
 0x198   : > { %v823_v60 = vadd.f32 %v774_v14, %v1525_v59 }
 0x199   : > { %v731_v61 = vpop.f32.mrf.mxu1 }
 0x19a   : > { %855 = vst [vmem:[%s1728_s18 + $0xb8] sm:$0xff] %v823_v60  ;;  %v732_v62 = vadd.f32 %v1721_v46, %v731_v61 }
 0x19c   : > { %v809_v53 = vadd.f32 %v732_v62, %v1556_v8 }
 0x19d   : > { %v776_v15 = vpop.f32.mrf.mxu3 }
 0x19e   : > { %v777_v63 = vadd.f32 %v1721_v46, %v776_v15  ;;  %841 = vst [vmem:[%s1728_s18 + $0x48] sm:$0xff] %v809_v53 }
 0x1a0   : > { %v824_v2 = vadd.f32 %v777_v63, %v1539_v1 }
 0x1a1   : > { %v734_v0 = vpop.f32.mrf.mxu1 }
 0x1a2   : > { %856 = vst [vmem:[%s1728_s18 + $0xc0] sm:$0xff] %v824_v2  ;;  %v735_v3 = vadd.f32 %v1721_v46, %v734_v0 }
 0x1a4   : > { %v810_v59 = vadd.f32 %v735_v3, %v1570_v17 }
 0x1a5   : > { %v779_v4 = vpop.f32.mrf.mxu3 }
 0x1a6   : > { %v780_v5 = vadd.f32 %v1721_v46, %v779_v4  ;;  %842 = vst [vmem:[%s1728_s18 + $0x50] sm:$0xff] %v810_v59 }
 0x1a8   : > { %v825_v8 = vadd.f32 %v780_v5, %v1553_v7 }
 0x1a9   : > { %v737_v24 = vpop.f32.mrf.mxu1 }
 0x1aa   : > { %857 = vst [vmem:[%s1728_s18 + $0xc8] sm:$0xff] %v825_v8  ;;  %v738_v6 = vadd.f32 %v1721_v46, %v737_v24 }
 0x1ac   : > { %v811_v1 = vadd.f32 %v738_v6, %v1584_v28 }
 0x1ad   : > { %v782_v11 = vpop.f32.mrf.mxu3 }
 0x1ae   : > { %v783_v13 = vadd.f32 %v1721_v46, %v782_v11  ;;  %843 = vst [vmem:[%s1728_s18 + $0x58] sm:$0xff] %v811_v1 }
 0x1b0   : > { %v826_v17 = vadd.f32 %v783_v13, %v1567_v16 }
 0x1b1   : > { %v740_v12 = vpop.f32.mrf.mxu1 }
 0x1b2   : > { %858 = vst [vmem:[%s1728_s18 + $0xd0] sm:$0xff] %v826_v17  ;;  %v741_v18 = vadd.f32 %v1721_v46, %v740_v12 }
 0x1b4   : > { %v812_v7 = vadd.f32 %v741_v18, %v1598_v44 }
 0x1b5   : > { %v785_v30 = vpop.f32.mrf.mxu3 }
 0x1b6   : > { %v786_v19 = vadd.f32 %v1721_v46, %v785_v30  ;;  %844 = vst [vmem:[%s1728_s18 + $0x60] sm:$0xff] %v812_v7 }
 0x1b8   : > { %v827_v28 = vadd.f32 %v786_v19, %v1581_v27 }
 0x1b9   : > { %v743_v20 = vpop.f32.mrf.mxu1 }
 0x1ba   : > { %859 = vst [vmem:[%s1728_s18 + $0xd8] sm:$0xff] %v827_v28  ;;  %v744_v23 = vadd.f32 %v1721_v46, %v743_v20 }
 0x1bc   : > { %v813_v16 = vadd.f32 %v744_v23, %v1612_v58 }
 0x1bd   : > { %v788_v25 = vpop.f32.mrf.mxu3 }
 0x1be   : > { %v789_v26 = vadd.f32 %v1721_v46, %v788_v25  ;;  %845 = vst [vmem:[%s1728_s18 + $0x68] sm:$0xff] %v813_v16 }
 0x1c0   : > { %v828_v44 = vadd.f32 %v789_v26, %v1595_v43 }
 0x1c1   : > { %v746_v36 = vpop.f32.mrf.mxu1 }
 0x1c2   : > { %860 = vst [vmem:[%s1728_s18 + $0xe0] sm:$0xff] %v828_v44  ;;  %v747_v31 = vadd.f32 %v1721_v46, %v746_v36 }
 0x1c4   : > { %v814_v27 = vadd.f32 %v747_v31, %v1626_v10 }
 0x1c5   : > { %v791_v32 = vpop.f32.mrf.mxu3 }
 0x1c6   : > { %v792_v29 = vadd.f32 %v1721_v46, %v791_v32  ;;  %846 = vst [vmem:[%s1728_s18 + $0x70] sm:$0xff] %v814_v27 }
 0x1c8   : > { %v829_v58 = vadd.f32 %v792_v29, %v1609_v57 }
 0x1c9   : > { %v749_v34 = vpop.f32.mrf.mxu1 }
 0x1ca   : > { %861 = vst [vmem:[%s1728_s18 + $0xe8] sm:$0xff] %v829_v58  ;;  %v750_v37 = vadd.f32 %v1721_v46, %v749_v34 }
 0x1cc   : > { %v815_v43 = vadd.f32 %v750_v37, %v1640_v22 }
 0x1cd   : > { %v794_v42 = vpop.f32.mrf.mxu3 }
 0x1ce   : > { %v795_v38 = vadd.f32 %v1721_v46, %v794_v42  ;;  %847 = vst [vmem:[%s1728_s18 + $0x78] sm:$0xff] %v815_v43 }
 0x1d0   : > { %v830_v10 = vadd.f32 %v795_v38, %v1623_v9 }
 0x1d2   : > { %862 = vst [vmem:[%s1728_s18 + $0xf0] sm:$0xff] %v830_v10 }
 0x1d5   : > { %v797_v57 = vpop.f32.mrf.mxu3 }
 0x1d6   : > { %v798_v39 = vadd.f32 %v1721_v46, %v797_v57 }
 0x1d8   : > { %v831_v22 = vadd.f32 %v798_v39, %v1637_v21 }
 0x1da   : > { %863 = vst [vmem:[%s1728_s18 + $0xf8] sm:$0xff] %v831_v22 }
 0x1db   : > { %1214 = shalt.err (!%p1211_p10)
}
 0x1dc   : > { %s1263_s13 = smov 128   ;;  %s1264_s17 = smov 8  }
 0x1dd   : > { %1034 = dma.vmem_to_hbm [thread:$0]  (%p1375_p3), %s878_s12, 4096, %s880_s30, %s865_s15, %s1263_s13, %s1263_s13, %s1264_s17  }
 0x1de PF: > { %s894_s18 = sand.u32 1, %s1245_s23   ;;  %p1872_p12 = scmp.ge.s32.totalorder %s1257_s26, 2 }
 0x1df   : > { %s895_s20 = scalar_lea.sflag [#allocation5], %s894_s18 }
 0x1e0   : > { %p1048_p13 = pnand %p1872_p12, %p1338_p6 }
 0x1e2   : > { %p1049_p0 = pneg %p1048_p13 }
 0x1e4   : > { %1240 = dma.done.wait (%p1049_p0), %s895_s20, 4096  }
 0x1e5   : > { %1242 = vsyncadd (%p1049_p0), %s895_s20, 4294963200  ;;  %p21_p5 = scmp.ge.s32.totalorder %s1365_s19, 4   ;;  %s1873_s23 = smov %s1249_s24 }
 0x1e6   : > { %s1874_s24 = smov %s1253_s25  ;;  %s1875_s25 = smov %s1381_s27 }
 0x1e7   : > { %s1876_s26 = smov %s1365_s19  ;;  %23 = sbr.rel (!%p21_p5) target bundleno = 8 (0x8), region = 97 }
 0x1ec   :  { %901 = vsyncpa [#allocation4], 1 }
 0x1ed   :  { %903 = vsyncpa [#allocation4 + $0x1], 1 }
 0x1ee   :  { %904 = vsyncpa [#allocation7], 1 }
 0x1ef   :  { %905 = vsyncpa [#allocation5], 1 }
 0x1f0   :  { %907 = vsyncpa [#allocation5 + $0x1], 1 }

</bundles_post_ra>
